<compile_context>
chip_gen: v7x
topology: tpu7x:2x2x1
jax: 0.10.0
libtpu: 0.0.40
codegen_flags: <defaults>
</compile_context>

<pallas_src>
import functools

import numpy as np
import jax
import jax.numpy as jnp
from jax import lax
from jax.experimental import pallas as pl
from jax.experimental.pallas import tpu as pltpu

_LANES = 128
_SUBLANES = 8
_K_CAP = 2048          # max lanes per K block in the general (row-sum) path


def _round_up(x: int, m: int) -> int:
    return (x + m - 1) // m * m


def _vmem_capacity_bytes() -> int:
    """Best-effort per-TensorCore VMEM size; conservative fallback (v7x-like)."""
    try:
        info = pltpu.get_tpu_info()
        for name in ("vmem_capacity_bytes", "vmem_bytes", "vmem_size_bytes"):
            v = getattr(info, name, None)
            if v:
                return int(v)
    except Exception:
        pass
    return 64 << 20


def _hw_budgets():
    """(per-step tile working-set budget, vmem_limit_bytes), generation aware."""
    cap = _vmem_capacity_bytes()
    if cap >= (96 << 20):          # v5e / v6e: 128 MiB VMEM per TensorCore
        return 20 << 20, 64 << 20
    return 10 << 20, 32 << 20      # v7x: 64 MiB per TensorCore


def _pick_blocks(n_rows: int, cap_rows: int):
    """Row-block size (multiple of 8, <= cap) and grid steps over n_rows.

    Prefers >= 2 (and even) block counts so the pipeline double-buffers DMA and
    v7x's two TensorCores split the 'parallel' axis evenly.  For tiny inputs the
    single block exactly matches the array shape (no ragged sublane block)."""
    n_rows = max(n_rows, 1)
    if n_rows <= _SUBLANES:
        return n_rows, 1
    r8 = _round_up(n_rows, _SUBLANES)
    cap = max(_SUBLANES, (cap_rows // _SUBLANES) * _SUBLANES)
    nb = max(2, pl.cdiv(r8, cap))
    if nb % 2:
        nb += 1                    # even -> both v7x TCs get equal work (no-op on 1-TC chips)
    block_rows = _round_up(pl.cdiv(r8, nb), _SUBLANES)
    grid = pl.cdiv(n_rows, block_rows)
    return block_rows, grid


# ----------------------------------------------------------------------------
# Packed path: floating inputs, D <= 64.  Pack P = 128 // D batch rows per lane
# row via a free row-major reshape (B, D) -> (rows, P*D); recover per-row dot
# products with a tiny segment-sum matmul on the otherwise idle MXU.
# ----------------------------------------------------------------------------
def _mf_packed_kernel(u_ref, i_ref, seg_ref, o_ref):
    prod = u_ref[...] * i_ref[...]                  # stays bf16 for bf16 inputs (half the VMEM)
    out = jnp.dot(prod, seg_ref[...], preferred_element_type=jnp.float32)
    o_ref[...] = out.astype(o_ref.dtype)


def _mf_packed(user, item, out_dtype):
    B, D = user.shape
    P = _LANES // D
    width = P * D
    in_dtype = user.dtype
    itemsize = jnp.dtype(in_dtype).itemsize
    out_itemsize = jnp.dtype(out_dtype).itemsize

    # Pad only when the packing reshape truly requires it, and only to the next
    # multiple of P (at most P-1 extra rows).
    b_pad = _round_up(B, P)
    if b_pad != B:
        user = jnp.pad(user, ((0, b_pad - B), (0, 0)))
        item = jnp.pad(item, ((0, b_pad - B), (0, 0)))
    n_rows = b_pad // P

    u2 = user.reshape(n_rows, width)   # free, row-major contiguous reshape
    i2 = item.reshape(n_rows, width)

    # Segment-sum matrix, built once on host and DMA'd into VMEM once (block revisited).
    lane = np.arange(width)[:, None]
    col = np.arange(P)[None, :]
    seg = jnp.asarray(((lane >= col * D) & (lane < (col + 1) * D)).astype(np.float32),
                      dtype=in_dtype)

    tile_budget, vmem_limit = _hw_budgets()
    width_vmem = _round_up(width, _LANES)
    # 2 inputs double-buffered + materialized product (MXU LHS) + double-buffered output.
    bytes_per_row = width_vmem * (4 * itemsize + itemsize) + 2 * P * out_itemsize
    cap_rows = max(_SUBLANES, tile_budget // bytes_per_row)

    block_rows, grid = _pick_blocks(n_rows, cap_rows)

    out = pl.pallas_call(
        _mf_packed_kernel,
        out_shape=jax.ShapeDtypeStruct((n_rows, P), out_dtype),
        grid=(grid,),
        in_specs=[
            pl.BlockSpec((block_rows, width), lambda i: (i, 0)),
            pl.BlockSpec((block_rows, width), lambda i: (i, 0)),
            pl.BlockSpec((width, P), lambda i: (0, 0)),       # constant block -> fetched once
        ],
        out_specs=pl.BlockSpec((block_rows, P), lambda i: (i, 0)),
        compiler_params=pltpu.CompilerParams(
            dimension_semantics=("parallel",),
            vmem_limit_bytes=vmem_limit,
        ),
    )(u2, i2, seg)

    return out.reshape(n_rows * P)[:B]


# ----------------------------------------------------------------------------
# General path: any D / any dtype.  Row blocks x K blocks with an f32 (or i32)
# VMEM accumulator; ragged final K block is masked in-kernel.
# ----------------------------------------------------------------------------
def _mf_rows_kernel(u_ref, i_ref, o_ref, acc_ref, *, d_total, block_k, acc_dtype):
    k = pl.program_id(1)

    @pl.when(k == 0)
    def _():
        acc_ref[...] = jnp.zeros_like(acc_ref)

    prod = u_ref[...].astype(acc_dtype) * i_ref[...].astype(acc_dtype)
    if d_total % block_k != 0:
        # Ragged final K block: out-of-bounds lanes are unspecified -> mask them.
        lane = lax.broadcasted_iota(jnp.int32, prod.shape, 1)
        prod = jnp.where(k * block_k + lane < d_total, prod, jnp.zeros_like(prod))
    acc_ref[...] += jnp.sum(prod, axis=1, keepdims=True)

    @pl.when(k == pl.num_programs(1) - 1)
    def _():
        o_ref[...] = acc_ref[...].astype(o_ref.dtype)


def _mf_rows(user, item, out_dtype, acc_dtype):
    B, D = user.shape
    itemsize = max(jnp.dtype(user.dtype).itemsize, jnp.dtype(item.dtype).itemsize)

    block_k = D if D <= _K_CAP else _K_CAP
    nk = pl.cdiv(D, block_k)

    tile_budget, vmem_limit = _hw_budgets()
    k_vmem = _round_up(block_k, _LANES)
    # 2 inputs double-buffered + f32 product + accumulator + double-buffered output.
    bytes_per_row = k_vmem * (4 * itemsize + 4) + 4 + 2 * jnp.dtype(out_dtype).itemsize
    cap_rows = max(_SUBLANES, tile_budget // bytes_per_row)

    block_b, grid_b = _pick_blocks(B, cap_rows)

    out = pl.pallas_call(
        functools.partial(_mf_rows_kernel, d_total=D, block_k=block_k, acc_dtype=acc_dtype),
        out_shape=jax.ShapeDtypeStruct((B, 1), out_dtype),
        grid=(grid_b, nk),
        in_specs=[
            pl.BlockSpec((block_b, block_k), lambda i, k: (i, k)),
            pl.BlockSpec((block_b, block_k), lambda i, k: (i, k)),
        ],
        out_specs=pl.BlockSpec((block_b, 1), lambda i, k: (i, 0)),
        scratch_shapes=[pltpu.VMEM((block_b, 1), acc_dtype)],
        compiler_params=pltpu.CompilerParams(
            dimension_semantics=("parallel", "arbitrary"),
            vmem_limit_bytes=vmem_limit,
        ),
    )(user, item)

    return out[:, 0]


# ----------------------------------------------------------------------------
# Public entry point: rating[b] = sum_d user[b, d] * item[b, d]
# ----------------------------------------------------------------------------
def mf_forward(user: jax.Array, item: jax.Array) -> jax.Array:
    assert user.ndim == 2 and item.ndim == 2 and user.shape == item.shape
    _, D = user.shape
    out_dtype = jnp.result_type(user.dtype, item.dtype)
    floating = jnp.issubdtype(out_dtype, jnp.floating)
    # TODO(synk): torch.sum promotes integer inputs to int64; this kernel accumulates in int32.
    acc_dtype = jnp.float32 if floating else jnp.int32

    if user.dtype != out_dtype:
        user = user.astype(out_dtype)
    if item.dtype != out_dtype:
        item = item.astype(out_dtype)

    if floating and D >= 1 and (_LANES // D) >= 2:        # D <= 64: lane-packing pays off
        return _mf_packed(user, item, out_dtype)
    return _mf_rows(user, item, out_dtype, acc_dtype)


if __name__ == "__main__":
    # MF.__init__ defines no parameters; user/item embeddings are the inputs.
    key = jax.random.PRNGKey(0)
    keys = jax.random.split(key, 14)

    def _check(u, i, atol, rtol):
        r = jax.block_until_ready(mf_forward(u, i))
        ref = jnp.sum(u.astype(jnp.float32) * i.astype(jnp.float32), axis=1)
        assert r.shape == (u.shape[0],)
        assert jnp.allclose(r.astype(jnp.float32), ref, atol=atol, rtol=rtol), (
            u.shape, u.dtype, float(jnp.max(jnp.abs(r.astype(jnp.float32) - ref))))

    # 1) Small demo shapes (packed path, single exact block).
    u = jax.random.normal(keys[0], (8, 32), jnp.float32)
    i = jax.random.normal(keys[1], (8, 32), jnp.float32)
    _check(u, i, 1e-5, 1e-5)

    # 2) Larger batch, no padding, ragged last row block (packed, multi-step grid).
    u = jax.random.normal(keys[2], (300, 32), jnp.float32)
    i = jax.random.normal(keys[3], (300, 32), jnp.float32)
    _check(u, i, 1e-4, 1e-4)

    # 3) Batch not a multiple of P (minimal pad to next multiple of P only).
    u = jax.random.normal(keys[4], (13, 32), jnp.float32)
    i = jax.random.normal(keys[5], (13, 32), jnp.float32)
    _check(u, i, 1e-5, 1e-5)

    # 4) Embedding dim that does not divide 128 (extended packed path: P=2, width=96).
    u = jax.random.normal(keys[6], (10, 48), jnp.float32)
    i = jax.random.normal(keys[7], (10, 48), jnp.float32)
    _check(u, i, 1e-5, 1e-5)

    # 5) Mid-size D (general path, single K block, ragged row block).
    u = jax.random.normal(keys[8], (12, 200), jnp.float32)
    i = jax.random.normal(keys[9], (12, 200), jnp.float32)
    _check(u, i, 1e-4, 1e-4)

    # 6) Large D (general path, K-tiled reduction with masked ragged last K block).
    u = jax.random.normal(keys[10], (16, 3000), jnp.float32)
    i = jax.random.normal(keys[11], (16, 3000), jnp.float32)
    _check(u, i, 1e-3, 1e-4)

    # 7) bf16 inputs (packed path, bf16 MXU operands, f32 accumulation).
    u = jax.random.normal(keys[12], (64, 32), jnp.float32).astype(jnp.bfloat16)
    i = jax.random.normal(keys[13], (64, 32), jnp.float32).astype(jnp.bfloat16)
    _check(u, i, 0.15, 0.05)

    print("KERNEL_OK")
</pallas_src>

<mosaic_0001>
module attributes {stable_mosaic.version = 11 : i64} {
  func.func @_mf_packed_kernel(%arg0: i32, %arg1: memref<2x128xf32, #tpu.memory_space<vmem>>, %arg2: memref<2x128xf32, #tpu.memory_space<vmem>>, %arg3: memref<128x4xf32, #tpu.memory_space<vmem>>, %arg4: memref<2x4xf32, #tpu.memory_space<vmem>>) attributes {dimension_semantics = [#tpu.dimension_semantics<parallel>], iteration_bounds = array<i64: 1>, scalar_prefetch = 0 : i64, scratch_operands = 0 : i64, tpu.core_type = #tpu.core_type<tc>, window_params = [{transform_indices = @transform_0, window_bounds = array<i64: 2, 128>}, {transform_indices = @transform_1, window_bounds = array<i64: 2, 128>}, {pipeline_mode = #tpu.pipeline_mode<synchronous>, transform_indices = @transform_2, window_bounds = array<i64: 128, 4>}, {transform_indices = @transform_3, window_bounds = array<i64: 2, 4>}]} {
    %c0 = arith.constant 0 : index
    %c0_0 = arith.constant 0 : index
    %0 = vector.load %arg1[%c0, %c0_0] : memref<2x128xf32, #tpu.memory_space<vmem>>, vector<2x128xf32>
    %c0_1 = arith.constant 0 : index
    %c0_2 = arith.constant 0 : index
    %1 = vector.load %arg2[%c0_1, %c0_2] : memref<2x128xf32, #tpu.memory_space<vmem>>, vector<2x128xf32>
    %2 = arith.mulf %0, %1 : vector<2x128xf32>
    %c0_3 = arith.constant 0 : index
    %c0_4 = arith.constant 0 : index
    %3 = vector.load %arg3[%c0_3, %c0_4] : memref<128x4xf32, #tpu.memory_space<vmem>>, vector<128x4xf32>
    %cst = arith.constant dense<0.000000e+00> : vector<2x4xf32>
    %4 = tpu.matmul %2, %3, %cst {dimension_numbers = #tpu.dot_dimension_numbers<[1], [0], [0], [1], [0, 0, 1, 1], [], []>} : vector<2x128xf32>, vector<128x4xf32>, vector<2x4xf32> -> vector<2x4xf32>
    %c0_5 = arith.constant 0 : index
    %c0_6 = arith.constant 0 : index
    %5 = vector.load %arg4[%c0_5, %c0_6] : memref<2x4xf32, #tpu.memory_space<vmem>>, vector<2x4xf32>
    tpu.vector_store %arg4[%c0_5, %c0_6], %4 {strides = array<i32>} : memref<2x4xf32, #tpu.memory_space<vmem>>, vector<2x4xf32>,
    return
  }
  func.func @transform_0(%arg0: i32) -> (i32, i32) {
    %c0_i32 = arith.constant 0 : i32
    %c0_i32_0 = arith.constant 0 : i32
    return %arg0, %c0_i32 : i32, i32
  }
  func.func @transform_1(%arg0: i32) -> (i32, i32) {
    %c0_i32 = arith.constant 0 : i32
    %c0_i32_0 = arith.constant 0 : i32
    return %arg0, %c0_i32 : i32, i32
  }
  func.func @transform_2(%arg0: i32) -> (i32, i32) {
    %c0_i32 = arith.constant 0 : i32
    %c0_i32_0 = arith.constant 0 : i32
    %c0_i32_1 = arith.constant 0 : i32
    return %c0_i32, %c0_i32_0 : i32, i32
  }
  func.func @transform_3(%arg0: i32) -> (i32, i32) {
    %c0_i32 = arith.constant 0 : i32
    %c0_i32_0 = arith.constant 0 : i32
    return %arg0, %c0_i32 : i32, i32
  }
}

</mosaic_0001>

<bundles_post_ra>
// kernel: tpu_custom_call.1
= control target key start
LH: loop header
LB: loop body
LE: loop exit
PB: predicated region body
PF: predicated region fallthrough
CT: control target
= control target key end

     0   :  { %v224_v3 = vmov 0.0|0.0   ;;  %vm225_vm0 = vmmov 0   ;;  %v226_v6 = vmov 0.0   ;;  %s314_s0 = inlined_call_operand.vmem [shape: f32[2,128], index: 0, kind: input, shape index: {}]   ;;  %s315_s1 = inlined_call_operand.vmem [shape: f32[2,128], index: 1, kind: input, shape index: {}]   ;;  %s316_s2 = inlined_call_operand.vmem [shape: f32[128,4], index: 2, kind: input, shape index: {}]   ;;  %s317_s3 = inlined_call_operand.hbm [shape: f32[2,4], index: 3, kind: output, shape index: {}]  }
   0x1   :  { %v18_v0 = vld [vmem:[%s316_s2] sm:$0xff]  ;;  %v19_v1 = vld [vmem:[%s316_s2 + $0x8] sm:$0xff]  ;;  %v20_v2 = vld [vmem:[%s316_s2 + $0x10] sm:$0xff]  ;;  %172 = vmatprep.subr.bf16.mxu0 %v224_v3  ;;  %169 = vmatprep.mubr.msk.f32.mxu0 %vm225_vm0, %v226_v6 }
   0x2   :  { %v173_v4 = vpack.c.bf16 %v19_v1, %v18_v0  ;;  %v21_v5 = vld [vmem:[%s316_s2 + $0x18] sm:$0xff]  ;;  %v22_v8 = vld [vmem:[%s316_s2 + $0x20] sm:$0xff]  ;;  %v23_v9 = vld [vmem:[%s316_s2 + $0x28] sm:$0xff] }
   0x3   :  { %v176_v7 = vpack.c.bf16 %v21_v5, %v20_v2 }
   0x4   :  { %174 = vmatpush3.bf16.msra.mxu0 %v173_v4 }
   0x5   :  { %175 = vmatprep.subr.bf16.mxu0 %v224_v3 }
   0x6   :  { %8 = vsyncpa [#allocation3], 0  ;;  %v179_v10 = vpack.c.bf16 %v23_v9, %v22_v8  ;;  %v24_v11 = vld [vmem:[%s316_s2 + $0x30] sm:$0xff]  ;;  %v25_v12 = vld [vmem:[%s316_s2 + $0x38] sm:$0xff]  ;;  %s227_s21 = smov [#allocation2]   ;;  %vm104_vm1 = vcmask 25600  }
   0x7   :  { %v182_v13 = vpack.c.bf16 %v25_v12, %v24_v11  ;;  %v26_v14 = vld [vmem:[%s316_s2 + $0x40] sm:$0xff]  ;;  %v27_v15 = vld [vmem:[%s316_s2 + $0x48] sm:$0xff]  ;;  %v28_v17 = vld [vmem:[%s316_s2 + $0x50] sm:$0xff]  ;;  %s112_s22 = sshll.u32 %s227_s21, 4  ;;  %s113_s22 = int_to_ptr.vmem [resolvable:$true] %s112_s22 }
   0x8   :  { %177 = vmatpush3.bf16.msra.mxu0 %v176_v7  ;;  %v185_v16 = vpack.c.bf16 %v27_v15, %v26_v14  ;;  %v29_v18 = vld [vmem:[%s316_s2 + $0x58] sm:$0xff]  ;;  %v30_v20 = vld [vmem:[%s316_s2 + $0x60] sm:$0xff]  ;;  %v31_v21 = vld [vmem:[%s316_s2 + $0x68] sm:$0xff]  ;;  %p205_p1 = scmp.lt.s32.totalorder %s113_s22, %s113_s22 }
   0x9   :  { %178 = vmatprep.subr.bf16.mxu0 %v224_v3  ;;  %v188_v19 = vpack.c.bf16 %v29_v18, %v28_v17  ;;  %v191_v22 = vpack.c.bf16 %v31_v21, %v30_v20  ;;  %v32_v23 = vld [vmem:[%s316_s2 + $0x70] sm:$0xff]  ;;  %v33_v24 = vld [vmem:[%s316_s2 + $0x78] sm:$0xff]  ;;  %v15_v26 = vld [vmem:[%s314_s0] sm:$0x3]  ;;  %s200_s2 = scalar_lea.vmem %s113_s22, 32 }
   0xa   :  { %v194_v25 = vpack.c.bf16 %v33_v24, %v32_v23  ;;  %v16_v27 = vld [vmem:[%s315_s1] sm:$0x3]  ;;  %p201_p0 = scmp.ne.s32.totalorder %s113_s22, %s200_s2  ;;  %p206_p2 = scmp.lt.s32.totalorder %s200_s2, %s200_s2 }
   0xb   :  { %v17_v28 = vmul.f32 %v16_v27, %v15_v26 }
   0xc   :  { %180 = vmatpush3.bf16.msra.mxu0 %v179_v10  ;;  %p207_p3 = por %p206_p2, %p205_p1 }
   0xd   :  { %181 = vmatprep.subr.bf16.mxu0 %v224_v3 }
   0xe   :  { %p208_p4 = pnand %p207_p3, %p201_p0 }
  0x10   :  { %183 = vmatpush3.bf16.msra.mxu0 %v182_v13 }
  0x11   :  { %184 = vmatprep.subr.bf16.mxu0 %v224_v3 }
  0x14   :  { %186 = vmatpush3.bf16.msra.mxu0 %v185_v16 }
  0x15   :  { %187 = vmatprep.subr.bf16.mxu0 %v224_v3 }
  0x18   :  { %189 = vmatpush3.bf16.msra.mxu0 %v188_v19 }
  0x19   :  { %190 = vmatprep.subr.bf16.mxu0 %v224_v3 }
  0x1c   :  { %192 = vmatpush3.bf16.msra.mxu0 %v191_v22 }
  0x1d   :  { %193 = vmatprep.subr.bf16.mxu0 %v224_v3 }
  0x20   :  { %195 = vmatpush3.bf16.msra.mxu0 %v194_v25 }
  0x23   :  { %170 = vmatmul.mubr.f32.vlgmr.msra.gmra.mrb[0].mxu0 %v17_v28 }
  0xf6   :  { %v100_v29 = vpop.f32.mrb[0].mxu0 }
  0xf7   :  { %105 = vst.msk [vmem:[#allocation2] sm:$0x3] %vm104_vm1, %v100_v29  ;;  %v171_v30 = vpop.f32.mrb[1].mxu0 }
  0xf8   :  { %211 = shalt.err (!%p208_p4)
}
  0xf9   :  { %s212_s23 = scalar_lea.hbm %s317_s3, 32 }
  0xfa   :  { %p213_p5 = scmp.ne.s32.totalorder %s317_s3, %s212_s23  ;;  %p216_p6 = scmp.lt.u32.totalorder %s212_s23, %s317_s3 }
  0xfc   :  { %p218_p7 = pnand %p216_p6, %p213_p5 }
  0xfe   :  { %221 = shalt.err (!%p218_p7)
}
  0xff   :  { %115 = dma.vmem_to_hbm [thread:$0]  %s113_s22, 32, %s317_s3, [#allocation3]  }
 0x100   :  { %222 = dma.done.wait [#allocation3], 32  }
 0x101   :  { %223 = vsyncadd [#allocation3], 4294967264 }
 0x102   :  { %119 = vsyncpa [#allocation3], 1 }

</bundles_post_ra>
